<compile_context>
chip_gen: v7x
topology: tpu7x:2x2x1
jax: 0.10.0
libtpu: 0.0.40
codegen_flags: <defaults>
</compile_context>

<pallas_src>
import functools

import jax
import jax.numpy as jnp
from jax import lax
from jax.experimental import pallas as pl
from jax.experimental.pallas import tpu as pltpu


def _cx_kernel(i_ref, t_ref, out_ref, colmax_ref, *, inv_band_width):
    # i_ref: (1, TILE_M, C) L2-normalized I rows for one batch / one row tile.
    # t_ref: (1, C, S)      L2-normalized T features for the batch (resident).
    m = pl.program_id(1)
    last = pl.num_programs(1) - 1

    @pl.when(m == 0)
    def _init():
        # cx >= 0, so 0 is a valid identity for the running column max.
        colmax_ref[...] = jnp.zeros_like(colmax_ref)

    i_tile = i_ref[0]                       # (TILE_M, C) f32
    t_feat = t_ref[0]                       # (C, S) f32

    # Cosine similarity: plain (M, K) x (K, N) contraction on the MXU.
    # (Kept in f32: sim feeds a clamp at 1 and a tiny-denominator divide, so a
    #  bf16 cast here would risk the 1e-4 tolerance; with K = C tiny the
    #  matmul is not the bottleneck anyway.)
    sim = lax.dot_general(
        i_tile, t_feat, (((1,), (0,)), ((), ())),
        preferred_element_type=jnp.float32)  # (TILE_M, S)

    # cosine distance, clamped.
    raw = jnp.maximum((1.0 - sim) * 0.5, 0.0)

    # Relative distance (Eq. 2) folded with the 1/band_width of the exp:
    #   rel = raw / (min_k raw + 1e-5);  w = exp((b - rel)/bw)
    # The exp(b/bw) factor cancels in the row normalization below, so
    #   w ∝ exp(-raw * scale)   with   scale = 1/((min_k raw + 1e-5) * bw).
    div = jnp.min(raw, axis=-1, keepdims=True)              # (TILE_M, 1)
    scale = pl.reciprocal(div + 1e-5) * inv_band_width      # exact recip (O(S) EUP)
    w = jnp.exp(-raw * scale)

    inv_row_sum = pl.reciprocal(jnp.sum(w, axis=-1, keepdims=True))
    cx = w * inv_row_sum                                    # (TILE_M, S)

    # Running max over I positions (rows) per T position (column).
    colmax_ref[...] = jnp.maximum(colmax_ref[...],
                                  jnp.max(cx, axis=0, keepdims=True))

    @pl.when(m == last)
    def _finalize():
        s = colmax_ref.shape[-1]
        cs = jnp.sum(colmax_ref[...]) * (1.0 / s)           # mean over T positions
        out_ref[...] = jnp.full(out_ref.shape, cs, dtype=jnp.float32)


def _pick_tile_m(s, cap):
    """Largest multiple-of-8 divisor of s that is <= cap, else s (full dim)."""
    if s <= cap:
        return s
    for t in range(min(cap, s), 7, -1):
        if s % t == 0 and t % 8 == 0:
            return t
    return s


def contextual_loss_cosine(images, gt, *, b=1.0, band_width=0.5, tile_m=256):
    """images, gt: NCHW float arrays (same shape). Returns scalar CX loss.

    tile_m: I-row tile size. Re-derive per generation / image size:
      v7x (64 MiB VMEM): ~256 at S=4096; v6e: 512-1024; v5e: ~256.
    """
    del b  # exp(b/band_width) cancels in the per-row normalization.
    N, C, H, W = images.shape
    S = H * W

    # --- hoisted preprocessing (cheap, fused by XLA with the reshapes) ------
    mean_T = jnp.mean(gt, axis=(0, 2, 3), keepdims=True)
    I = (images - mean_T).astype(jnp.float32)
    T = (gt - mean_T).astype(jnp.float32)
    # F.normalize(p=2, dim=channel, eps=1e-12)
    I = I / jnp.maximum(jnp.linalg.norm(I, axis=1, keepdims=True), 1e-12)
    T = T / jnp.maximum(jnp.linalg.norm(T, axis=1, keepdims=True), 1e-12)

    # I -> (N, S, C) so rows (I positions) tile on the sublane axis.
    # T stays (N, C, S): the kernel dot is a native (M,K)x(K,N) -> no in-kernel
    # transpose, and T is DMA'd once per batch (index constant across row tiles).
    I = jnp.transpose(I.reshape(N, C, S), (0, 2, 1))
    T = T.reshape(N, C, S)

    tile_m_eff = _pick_tile_m(S, tile_m)
    num_row_tiles = S // tile_m_eff

    kernel = functools.partial(_cx_kernel, inv_band_width=1.0 / band_width)

    cs_tile = pl.pallas_call(
        kernel,
        out_shape=jax.ShapeDtypeStruct((N, 1, 128), jnp.float32),
        grid=(N, num_row_tiles),
        in_specs=[
            pl.BlockSpec((1, tile_m_eff, C), lambda n, m: (n, m, 0)),  # I row tile
            pl.BlockSpec((1, C, S), lambda n, m: (n, 0, 0)),           # T resident
        ],
        out_specs=pl.BlockSpec((1, 1, 128), lambda n, m: (n, 0, 0)),
        scratch_shapes=[pltpu.VMEM((1, S), jnp.float32)],              # column max
        compiler_params=pltpu.CompilerParams(
            dimension_semantics=("parallel", "arbitrary"),
            vmem_limit_bytes=48 * 1024 * 1024),
    )(I, T)

    CS = cs_tile[:, 0, 0]                                              # (N,)
    return jnp.mean(-jnp.log(CS))


def _reference_loss(images, gt, *, b=1.0, band_width=0.5):
    """Pure-JAX reference mirroring the PyTorch cosine CX loss."""
    N, C, H, W = images.shape
    S = H * W
    mean_T = jnp.mean(gt, axis=(0, 2, 3), keepdims=True)
    I = (images - mean_T).astype(jnp.float32)
    T = (gt - mean_T).astype(jnp.float32)
    I = I / jnp.maximum(jnp.linalg.norm(I, axis=1, keepdims=True), 1e-12)
    T = T / jnp.maximum(jnp.linalg.norm(T, axis=1, keepdims=True), 1e-12)
    Iv = I.reshape(N, C, S)
    Tv = T.reshape(N, C, S)
    sim = jnp.einsum("ncs,nck->nsk", Iv, Tv)
    raw = jnp.maximum((1.0 - sim) * 0.5, 0.0)
    rel = raw / (jnp.min(raw, axis=-1, keepdims=True) + 1e-5)
    w = jnp.exp((b - rel) / band_width)
    cx = w / jnp.sum(w, axis=-1, keepdims=True)
    CS = jnp.mean(jnp.max(cx, axis=1), axis=-1)
    return jnp.mean(-jnp.log(CS))


if __name__ == "__main__":
    key = jax.random.PRNGKey(0)
    k1, k2 = jax.random.split(key)
    N, C, H, W = 2, 4, 16, 16
    images = jax.random.normal(k1, (N, C, H, W), dtype=jnp.float32)
    gt = jax.random.normal(k2, (N, C, H, W), dtype=jnp.float32)

    # tile_m=128 so the small S=256 case exercises the row-tiled accumulator path.
    loss = contextual_loss_cosine(images, gt, b=1.0, band_width=0.5, tile_m=128)
    loss = jax.block_until_ready(loss)

    ref = jax.block_until_ready(_reference_loss(images, gt, b=1.0, band_width=0.5))
    assert jnp.isfinite(loss), "loss is not finite"
    assert jnp.allclose(loss, ref, rtol=1e-4, atol=1e-4), (loss, ref)

    print("KERNEL_OK")
</pallas_src>

<mosaic_0001>
module attributes {stable_mosaic.version = 11 : i64} {
  func.func @_cx_kernel(%arg0: i32, %arg1: i32, %arg2: memref<1x128x4xf32, #tpu.memory_space<vmem>>, %arg3: memref<1x4x256xf32, #tpu.memory_space<vmem>>, %arg4: memref<1x1x128xf32, #tpu.memory_space<vmem>>, %arg5: memref<1x256xf32, #tpu.memory_space<vmem>>) attributes {dimension_semantics = [#tpu.dimension_semantics<parallel>, #tpu.dimension_semantics<arbitrary>], iteration_bounds = array<i64: 2, 2>, scalar_prefetch = 0 : i64, scratch_operands = 1 : i64, tpu.core_type = #tpu.core_type<tc>, window_params = [{transform_indices = @transform_0, window_bounds = array<i64: 1, 128, 4>}, {transform_indices = @transform_1, window_bounds = array<i64: 1, 4, 256>}, {transform_indices = @transform_2, window_bounds = array<i64: 1, 1, 128>}]} {
    %c0_i32 = arith.constant 0 : i32
    %0 = arith.cmpi eq, %arg1, %c0_i32 : i32
    %1 = arith.extui %0 : i1 to i32
    %c0_i32_0 = arith.constant 0 : i32
    %2 = arith.cmpi ne, %1, %c0_i32_0 : i32
    scf.if %2 {
      %cst_20 = arith.constant 0.000000e+00 : f32
      %39 = vector.broadcast %cst_20 : f32 to vector<1x256xf32>
      %c0_21 = arith.constant 0 : index
      %c0_22 = arith.constant 0 : index
      %40 = vector.load %arg5[%c0_21, %c0_22] : memref<1x256xf32, #tpu.memory_space<vmem>>, vector<1x256xf32>
      tpu.vector_store %arg5[%c0_21, %c0_22], %39 {strides = array<i32>} : memref<1x256xf32, #tpu.memory_space<vmem>>, vector<1x256xf32>,
    } else {
    }
    %c0 = arith.constant 0 : index
    %c0_1 = arith.constant 0 : index
    %c0_2 = arith.constant 0 : index
    %3 = vector.load %arg2[%c0, %c0_1, %c0_2] : memref<1x128x4xf32, #tpu.memory_space<vmem>>, vector<1x128x4xf32>
    %4 = vector.shape_cast %3 : vector<1x128x4xf32> to vector<128x4xf32>
    %c0_3 = arith.constant 0 : index
    %c0_4 = arith.constant 0 : index
    %c0_5 = arith.constant 0 : index
    %5 = vector.load %arg3[%c0_3, %c0_4, %c0_5] : memref<1x4x256xf32, #tpu.memory_space<vmem>>, vector<1x4x256xf32>
    %6 = vector.shape_cast %5 : vector<1x4x256xf32> to vector<4x256xf32>
    %cst = arith.constant dense<0.000000e+00> : vector<128x256xf32>
    %7 = tpu.matmul %4, %6, %cst {dimension_numbers = #tpu.dot_dimension_numbers<[1], [0], [0], [1], [0, 0, 1, 1], [], []>} : vector<128x4xf32>, vector<4x256xf32>, vector<128x256xf32> -> vector<128x256xf32>
    %cst_6 = arith.constant 1.000000e+00 : f32
    %8 = vector.broadcast %cst_6 : f32 to vector<128x256xf32>
    %9 = arith.subf %8, %7 : vector<128x256xf32>
    %cst_7 = arith.constant 5.000000e-01 : f32
    %10 = vector.broadcast %cst_7 : f32 to vector<128x256xf32>
    %11 = arith.mulf %9, %10 : vector<128x256xf32>
    %cst_8 = arith.constant 0.000000e+00 : f32
    %12 = vector.broadcast %cst_8 : f32 to vector<128x256xf32>
    %13 = arith.maximumf %11, %12 : vector<128x256xf32>
    %cst_9 = arith.constant dense<0x7F800000> : vector<128xf32>
    %14 = vector.multi_reduction <minimumf>, %13, %cst_9 [1] : vector<128x256xf32> to vector<128xf32>
    %15 = vector.shape_cast %14 : vector<128xf32> to vector<128x1xf32>
    %cst_10 = arith.constant 9.99999974E-6 : f32
    %16 = vector.broadcast %cst_10 : f32 to vector<128x1xf32>
    %17 = arith.addf %15, %16 : vector<128x1xf32>
    %18 = tpu.reciprocal %17 : vector<128x1xf32> -> vector<128x1xf32>
    %cst_11 = arith.constant 2.000000e+00 : f32
    %19 = vector.broadcast %cst_11 : f32 to vector<128x1xf32>
    %20 = arith.mulf %18, %19 : vector<128x1xf32>
    %cst_12 = arith.constant 0.000000e+00 : f32
    %21 = vector.broadcast %cst_12 : f32 to vector<128x256xf32>
    %22 = arith.subf %21, %13 : vector<128x256xf32>
    %23 = vector.broadcast %20 : vector<128x1xf32> to vector<128x256xf32>
    %24 = arith.mulf %22, %23 : vector<128x256xf32>
    %25 = math.exp %24 : vector<128x256xf32>
    %cst_13 = arith.constant dense<0.000000e+00> : vector<128xf32>
    %26 = vector.multi_reduction <add>, %25, %cst_13 [1] : vector<128x256xf32> to vector<128xf32>
    %27 = vector.shape_cast %26 : vector<128xf32> to vector<128x1xf32>
    %28 = tpu.reciprocal %27 : vector<128x1xf32> -> vector<128x1xf32>
    %29 = vector.broadcast %28 : vector<128x1xf32> to vector<128x256xf32>
    %30 = arith.mulf %25, %29 : vector<128x256xf32>
    %c0_14 = arith.constant 0 : index
    %c0_15 = arith.constant 0 : index
    %31 = vector.load %arg5[%c0_14, %c0_15] : memref<1x256xf32, #tpu.memory_space<vmem>>, vector<1x256xf32>
    %cst_16 = arith.constant dense<0xFF800000> : vector<256xf32>
    %32 = vector.multi_reduction <maximumf>, %30, %cst_16 [0] : vector<128x256xf32> to vector<256xf32>
    %33 = vector.shape_cast %32 : vector<256xf32> to vector<1x256xf32>
    %34 = arith.maximumf %31, %33 : vector<1x256xf32>
    %c0_17 = arith.constant 0 : index
    %c0_18 = arith.constant 0 : index
    %35 = vector.load %arg5[%c0_17, %c0_18] : memref<1x256xf32, #tpu.memory_space<vmem>>, vector<1x256xf32>
    tpu.vector_store %arg5[%c0_17, %c0_18], %34 {strides = array<i32>} : memref<1x256xf32, #tpu.memory_space<vmem>>, vector<1x256xf32>,
    %c1_i32 = arith.constant 1 : i32
    %36 = arith.cmpi eq, %arg1, %c1_i32 : i32
    %37 = arith.extui %36 : i1 to i32
    %c0_i32_19 = arith.constant 0 : i32
    %38 = arith.cmpi ne, %37, %c0_i32_19 : i32
    scf.if %38 {
      %c0_20 = arith.constant 0 : index
      %c0_21 = arith.constant 0 : index
      %39 = vector.load %arg5[%c0_20, %c0_21] : memref<1x256xf32, #tpu.memory_space<vmem>>, vector<1x256xf32>
      %40 = vector.shape_cast %39 : vector<1x256xf32> to vector<1x1x256xf32>
      %cst_22 = arith.constant dense<0.000000e+00> : vector<1xf32>
      %41 = vector.multi_reduction <add>, %40, %cst_22 [1, 2] : vector<1x1x256xf32> to vector<1xf32>
      %42 = vector.shape_cast %41 : vector<1xf32> to vector<1x1x1xf32>
      %43 = vector.extract %42[0, 0, 0] : f32 from vector<1x1x1xf32>
      %cst_23 = arith.constant 3.906250e-03 : f32
      %44 = arith.mulf %43, %cst_23 : f32
      %45 = vector.broadcast %44 : f32 to vector<1x1x128xf32>
      %c0_24 = arith.constant 0 : index
      %c0_25 = arith.constant 0 : index
      %c0_26 = arith.constant 0 : index
      %46 = vector.load %arg4[%c0_24, %c0_25, %c0_26] : memref<1x1x128xf32, #tpu.memory_space<vmem>>, vector<1x1x128xf32>
      tpu.vector_store %arg4[%c0_24, %c0_25, %c0_26], %45 {strides = array<i32>} : memref<1x1x128xf32, #tpu.memory_space<vmem>>, vector<1x1x128xf32>,
    } else {
    }
    return
  }
  func.func @transform_0(%arg0: i32, %arg1: i32) -> (i32, i32, i32) {
    %c0_i32 = arith.constant 0 : i32
    %c0_i32_0 = arith.constant 0 : i32
    return %arg0, %arg1, %c0_i32 : i32, i32, i32
  }
  func.func @transform_1(%arg0: i32, %arg1: i32) -> (i32, i32, i32) {
    %c0_i32 = arith.constant 0 : i32
    %c0_i32_0 = arith.constant 0 : i32
    %c0_i32_1 = arith.constant 0 : i32
    return %arg0, %c0_i32, %c0_i32_0 : i32, i32, i32
  }
  func.func @transform_2(%arg0: i32, %arg1: i32) -> (i32, i32, i32) {
    %c0_i32 = arith.constant 0 : i32
    %c0_i32_0 = arith.constant 0 : i32
    %c0_i32_1 = arith.constant 0 : i32
    return %arg0, %c0_i32, %c0_i32_0 : i32, i32, i32
  }
}

</mosaic_0001>

<bundles_post_ra>
// kernel: tpu_custom_call.1
= control target key start
LH: loop header
LB: loop body
LE: loop exit
PB: predicated region body
PF: predicated region fallthrough
CT: control target
= control target key end

     0   :  { %7 = vsyncpa [#allocation4], 0  ;;  %s1926_s0 = inlined_call_operand.vmem [shape: f32[2,256,4], index: 0, kind: input, shape index: {}]   ;;  %s1927_s1 = inlined_call_operand.vmem [shape: f32[2,4,256], index: 1, kind: input, shape index: {}]   ;;  %s1928_s2 = inlined_call_operand.hbm [shape: f32[2,1,128], index: 2, kind: output, shape index: {}]  }
   0x1   :  { %9 = vsyncpa [#allocation4 + $0x1], 0  ;;  %s1400_s9 = smov 0   ;;  %s1402_s10 = smov 0  }
   0x2   :  { %s1404_s11 = smov 0   ;;  %s1406_s12 = smov 0  }
   0x3   :  { %s1408_s13 = smov 0   ;;  %s1410_s14 = smov 0  }
   0x4   :  { %s1412_s15 = smov 0   ;;  %s1414_s16 = smov 0  }
   0x5 LB: > { %s1044_s17 = sadd.s32 4294967295, %s1379_s16   ;;  %s1045_s18 = sadd.s32 4294967294, %s1379_s16   ;;  %s1379_s16 = sphi %s1414_s16, %s15_s16   ;;  %s1375_s15 = sphi %s1412_s15, %s1967_s15   ;;  %s1371_s14 = sphi %s1410_s14, %s1966_s14   ;;  %s1367_s13 = sphi %s1408_s13, %s1965_s13   ;;  %s1363_s12 = sphi %s1406_s12, %s1964_s12   ;;  %s1359_s11 = sphi %s1404_s11, %s1963_s11   ;;  %s1355_s10 = sphi %s1402_s10, %s1962_s10   ;;  %s1351_s9 = sphi %s1400_s9, %s1961_s9  }
   0x6   : > { %s24_s19 = sadd.s32 1, %s1371_s14  ;;  %s27_s20 = sadd.s32 1, %s1375_s15 }
   0x7   : > { %p25_p0 = scmp.ge.s32.totalorder %s24_s19, 2  ;;  %p98_p1 = scmp.ne.s32.totalorder %s1359_s11, %s1355_s10 }
   0x8   : > { %p99_p2 = scmp.eq.s32.totalorder %s1044_s17, 3  ;;  %p104_p4 = scmp.ne.s32.totalorder %s1355_s10, %s1351_s9 }
   0x9   : > { %s1969_s19 = smov (%p25_p0, %s24_s19), 0  ;;  %s1971_s20 = smov (!%p25_p0, %s27_s20), %s1375_s15 }
   0xa   : > { %p1449_p3 = por %p99_p2, %p98_p1  ;;  %p29_p5 = scmp.ge.s32.totalorder %s1971_s20, 2 }
   0xb   : > { %p105_p6 = scmp.eq.s32.totalorder %s1045_s18, 3  ;;  %p1048_p7 = scmp.ge.s32.totalorder %s1379_s16, 1 }
   0xc   : > { %p144_p8 = scmp.lt.s32.totalorder %s1379_s16, 5  ;;  %s1973_s20 = smov (%p29_p5, %s1971_s20), 0 }
   0xd   : > { %p1459_p9 = por %p105_p6, %p104_p4  ;;  %s85_s23 = ssub.s32 %s1375_s15, %s1973_s20 }
   0xe   : > { %p145_p10 = pnand %p1048_p7, %p144_p8  ;;  %s88_s24 = sadd.s32 1, %s1359_s11 }
   0xf   : > { %p86_p11 = scmp.eq.s32.totalorder %s85_s23, 0  ;;  %s172_s26 = sand.u32 (!%p145_p10), 1, %s1355_s10  }
  0x10   : > { %148 = sbr.rel (%p145_p10) target bundleno = 904 (0x388), region = 28  ;;  %s1049_s27 = sshll.u32 (!%p145_p10), %s1363_s12, 4 }
  0x11   : > { %s1467_s25 = scalar_select %p86_p11, %s1359_s11, %s88_s24  }
  0x12   : > { %p175_p12 = scmp.lt.s32.totalorder (!%p145_p10), %s1367_s13, 1  ;;  %p177_p13 = scmp.lt.s32.totalorder (!%p145_p10), %s1049_s27, 31 }
  0x13   : > { %s1483_s23 = scalar_lea.vmem (!%p145_p10), [#allocation3], %s172_s26  ;;  %p1054_p0 = scmp.ne.s32.totalorder (!%p145_p10), %s1363_s12, 0 }
  0x17   : > { %s176_s28 = scalar_select %p175_p12, %s1367_s13, 1 }
  0x18   : > { %s1975_s27 = smov (!%p177_p13, %s1049_s27), 31  ;;  %192 = sbr.rel (%p1054_p0) target bundleno = 31 (0x1f), region = 32 }
  0x19   : > { %s1050_s29 = sshll.u32 %s176_s28, 5  ;;  %s1077_s30 = sshll.u32 %s176_s28, 3  ;;  %v193_v0 = vlaneseq (!%p1054_p0)  ;;  %v1381_v1 = vmov (!%p1054_p0), 0.0  }
  0x1a   : > { %s180_s3 = sadd.s32 %s1050_s29, %s1975_s27  ;;  %s188_s6 = scalar_lea.vmem %s1927_s1, %s1077_s30 }
  0x1b   : > { %s1051_s7 = sshll.u32 %s180_s3, 3  ;;  %vm195_vm0 = vcmp.lt.s32.totalorder (!%p1054_p0), %v193_v0, 256 }
  0x1c   : > { %s1479_s18 = scalar_lea.vmem %s1926_s0, %s1051_s7  ;;  %197 = vst.msk [vmem:[#allocation2] sm:$0x3] (!%p1054_p0), %vm195_vm0, %v1381_v1 }
  0x1f PF: > { %v214_v2 = vld [vmem:[%s188_s6] sm:$0xff]  ;;  %vm266_vm1 = vcmask 1043456   ;;  %v1382_v4 = vmov 0.0   ;;  %vm217_vm2 = vcmask 31744   ;;  %v199_v7 = vld [vmem:[%s1479_s18 + $0x8] sm:$0xff]  ;;  %v200_v9 = vld [vmem:[%s1479_s18 + $0x10] sm:$0xff] }
  0x20   : > { %v216_v3 = vcombine.high %v214_v2, %v214_v2  ;;  %335 = vmatprep.mubr.f32.mxu0 %v1382_v4  ;;  %383 = vmatprep.mubr.f32.mxu1 %v1382_v4  ;;  %v198_v5 = vld [vmem:[%s1479_s18] sm:$0xff]  ;;  %v207_v8 = vld [vmem:[%s1479_s18 + $0x48] sm:$0xff]  ;;  %v208_v10 = vld [vmem:[%s1479_s18 + $0x50] sm:$0xff]  ;;  %p1073_p1 = scmp.ne.s32.totalorder %s1363_s12, 1 }
  0x21   : > { %v206_v6 = vld [vmem:[%s1479_s18 + $0x40] sm:$0xff]  ;;  %v201_v11 = vld [vmem:[%s1479_s18 + $0x18] sm:$0xff]  ;;  %v203_v15 = vld [vmem:[%s1479_s18 + $0x28] sm:$0xff]  ;;  %vm931_vm4 = vcmask (!%p1073_p1), 1040384  }
  0x22   : > { %1055 = vmatprep.subr.msk.mxu0 %vm266_vm1, %v216_v3  ;;  %1078 = vmatprep.subr.msk.mxu1 %vm266_vm1, %v216_v3  ;;  %v209_v12 = vld [vmem:[%s1479_s18 + $0x58] sm:$0xff]  ;;  %v202_v13 = vld [vmem:[%s1479_s18 + $0x20] sm:$0xff]  ;;  %v211_v16 = vld [vmem:[%s1479_s18 + $0x68] sm:$0xff] }
  0x23   : > { %1056 = vmatpush1.msk.msra.mxu0 %vm266_vm1, %v214_v2  ;;  %1079 = vmatpush1.msk.msra.mxu1 %vm266_vm1, %v214_v2  ;;  %v210_v14 = vld [vmem:[%s1479_s18 + $0x60] sm:$0xff]  ;;  %v204_v17 = vld [vmem:[%s1479_s18 + $0x30] sm:$0xff]  ;;  %v205_v19 = vld [vmem:[%s1479_s18 + $0x38] sm:$0xff] }
  0x24   : > { %1057 = vmatmul.mubr.msk.f32.vlgmr.msra.gmra.mrb[0].mxu0 %vm217_vm2, %v198_v5  ;;  %1065 = vmatmul.mubr.msk.f32.vlgmr.msra.gmra.mrb[0].mxu1 %vm217_vm2, %v206_v6  ;;  %v212_v18 = vld [vmem:[%s1479_s18 + $0x70] sm:$0xff]  ;;  %v213_v20 = vld [vmem:[%s1479_s18 + $0x78] sm:$0xff] }
  0x25   : > { %341 = vmatprep.mubr.f32.mxu0 %v1382_v4  ;;  %389 = vmatprep.mubr.f32.mxu1 %v1382_v4 }
  0x28   : > { %1058 = vmatmul.mubr.msk.f32.gmra.mrb[2].mxu0 %vm217_vm2, %v199_v7  ;;  %1066 = vmatmul.mubr.msk.f32.gmra.mrb[2].mxu1 %vm217_vm2, %v207_v8 }
  0x29   : > { %347 = vmatprep.mubr.f32.mxu0 %v1382_v4  ;;  %395 = vmatprep.mubr.f32.mxu1 %v1382_v4 }
  0x2c   : > { %1059 = vmatmul.mubr.msk.f32.gmra.mrb[4].mxu0 %vm217_vm2, %v200_v9  ;;  %1067 = vmatmul.mubr.msk.f32.gmra.mrb[4].mxu1 %vm217_vm2, %v208_v10 }
  0x2d   : > { %353 = vmatprep.mubr.f32.mxu0 %v1382_v4  ;;  %401 = vmatprep.mubr.f32.mxu1 %v1382_v4 }
  0x30   : > { %1060 = vmatmul.mubr.msk.f32.gmra.mrb[6].mxu0 %vm217_vm2, %v201_v11  ;;  %1068 = vmatmul.mubr.msk.f32.gmra.mrb[6].mxu1 %vm217_vm2, %v209_v12 }
  0x31   : > { %359 = vmatprep.mubr.f32.mxu0 %v1382_v4  ;;  %407 = vmatprep.mubr.f32.mxu1 %v1382_v4 }
  0x34   : > { %1061 = vmatmul.mubr.msk.f32.gmra.mrb[8].mxu0 %vm217_vm2, %v202_v13  ;;  %1069 = vmatmul.mubr.msk.f32.gmra.mrb[8].mxu1 %vm217_vm2, %v210_v14 }
  0x35   : > { %365 = vmatprep.mubr.f32.mxu0 %v1382_v4  ;;  %413 = vmatprep.mubr.f32.mxu1 %v1382_v4 }
  0x38   : > { %1062 = vmatmul.mubr.msk.f32.gmra.mrb[10].mxu0 %vm217_vm2, %v203_v15  ;;  %1070 = vmatmul.mubr.msk.f32.gmra.mrb[10].mxu1 %vm217_vm2, %v211_v16 }
  0x39   : > { %371 = vmatprep.mubr.f32.mxu0 %v1382_v4  ;;  %419 = vmatprep.mubr.f32.mxu1 %v1382_v4 }
  0x3c   : > { %1063 = vmatmul.mubr.msk.f32.gmra.mrb[12].mxu0 %vm217_vm2, %v204_v17  ;;  %1071 = vmatmul.mubr.msk.f32.gmra.mrb[12].mxu1 %vm217_vm2, %v212_v18 }
  0x3d   : > { %377 = vmatprep.mubr.f32.mxu0 %v1382_v4  ;;  %425 = vmatprep.mubr.f32.mxu1 %v1382_v4 }
  0x40   : > { %1064 = vmatmul.mubr.msk.f32.gmra.mrb[14].mxu0 %vm217_vm2, %v205_v19  ;;  %1072 = vmatmul.mubr.msk.f32.gmra.mrb[14].mxu1 %vm217_vm2, %v213_v20 }
  0xf7   : > { %v337_v21 = vpop.f32.mrb[0].mxu0  ;;  %v385_v22 = vpop.f32.mrb[0].mxu1 }
  0xf8   : > { %v432_v23 = vsub.f32 1.0, %v337_v21  ;;  %v339_v24 = vpop.f32.mrb[1].mxu0  ;;  %v448_v25 = vsub.f32 1.0, %v385_v22  ;;  %v387_v26 = vpop.f32.mrb[1].mxu1 }
  0xf9   : > { %v433_v27 = vsub.f32 1.0, %v339_v24  ;;  %v449_v28 = vsub.f32 1.0, %v387_v26 }
  0xfa   : > { %v1518_v29 = vmul.f32 0.5, %v432_v23  ;;  %v1522_v31 = vmul.f32 0.5, %v448_v25 }
  0xfb   : > { %v1520_v30 = vmul.f32 0.5, %v433_v27  ;;  %v1524_v32 = vmul.f32 0.5, %v449_v28  ;;  %v343_v33 = vpop.f32.mrb[2].mxu0  ;;  %v391_v34 = vpop.f32.mrb[2].mxu1 }
  0xfc   : > { %v496_v35 = vmax.f32 %v1518_v29, 0.0  ;;  %v434_v36 = vsub.f32 1.0, %v343_v33  ;;  %v450_v37 = vsub.f32 1.0, %v391_v34  ;;  %v345_v38 = vpop.f32.mrb[3].mxu0  ;;  %v393_v39 = vpop.f32.mrb[3].mxu1  ;;  %v512_v44 = vmax.f32 %v1522_v31, 0.0 }
  0xfd   : > { %v497_v40 = vmax.f32 %v1520_v30, 0.0  ;;  %v435_v41 = vsub.f32 1.0, %v345_v38  ;;  %v451_v42 = vsub.f32 1.0, %v393_v39  ;;  %v513_v45 = vmax.f32 %v1524_v32, 0.0 }
  0xfe   : > { %v1528_v43 = vmul.f32 0.5, %v450_v37  ;;  %v1534_v49 = vmul.f32 0.5, %v434_v36 }
  0xff   : > { %v1532_v46 = vmul.f32 0.5, %v451_v42  ;;  %v349_v47 = vpop.f32.mrb[4].mxu0  ;;  %v397_v48 = vpop.f32.mrb[4].mxu1  ;;  %v528_v53 = vmin.f32 %v496_v35, %v497_v40  ;;  %v1541_v55 = vmul.f32 0.5, %v435_v41  ;;  %v552_v9 = vmin.f32 %v512_v44, %v513_v45 }
 0x100   : > { %v514_v50 = vmax.f32 %v1528_v43, 0.0  ;;  %v436_v51 = vsub.f32 1.0, %v349_v47  ;;  %v351_v52 = vpop.f32.mrb[5].mxu0  ;;  %v399_v54 = vpop.f32.mrb[5].mxu1  ;;  %v452_v58 = vsub.f32 1.0, %v397_v48  ;;  %v498_v6 = vmax.f32 %v1534_v49, 0.0 }
 0x101   : > { %v515_v56 = vmax.f32 %v1532_v46, 0.0  ;;  %v437_v57 = vsub.f32 1.0, %v351_v52  ;;  %529 = vmin.xlane.f32.xlu0 %v528_v53  ;;  %v453_v60 = vsub.f32 1.0, %v399_v54  ;;  %v499_v7 = vmax.f32 %v1541_v55, 0.0 }
 0x102   : > { %v1544_v59 = vmul.f32 0.5, %v436_v51  ;;  %v1548_v63 = vmul.f32 0.5, %v452_v58  ;;  %v626_v29 = vsub.f32 0.0, %v498_v6  ;;  %v642_v30 = vsub.f32 0.0, %v514_v50 }
 0x103   : > { %v1546_v61 = vmul.f32 0.5, %v437_v57  ;;  %v355_v62 = vpop.f32.mrb[6].mxu0  ;;  %v403_v0 = vpop.f32.mrb[6].mxu1  ;;  %v1550_v3 = vmul.f32 0.5, %v453_v60  ;;  %v555_v4 = vmin.f32 %v514_v50, %v515_v56  ;;  %v531_v28 = vmin.f32 %v498_v6, %v499_v7 }
 0x104   : > { %v438_v1 = vsub.f32 1.0, %v355_v62  ;;  %v357_v2 = vpop.f32.mrb[7].mxu0  ;;  %v405_v5 = vpop.f32.mrb[7].mxu1  ;;  %v500_v10 = vmax.f32 %v1544_v59, 0.0  ;;  %v454_v13 = vsub.f32 1.0, %v403_v0  ;;  %v516_v14 = vmax.f32 %v1548_v63, 0.0 }
 0x105   : > { %v439_v8 = vsub.f32 1.0, %v357_v2  ;;  %v501_v11 = vmax.f32 %v1546_v61, 0.0  ;;  %556 = vmin.xlane.f32.xlu1 %v555_v4  ;;  %v517_v16 = vmax.f32 %v1550_v3, 0.0  ;;  %553 = vmin.xlane.f32.xlu0 %v552_v9  ;;  %v455_v18 = vsub.f32 1.0, %v405_v5 }
 0x106   : > { %v1564_v12 = vmul.f32 0.5, %v438_v1  ;;  %v1571_v22 = vmul.f32 0.5, %v454_v13  ;;  %v643_v31 = vsub.f32 0.0, %v515_v56  ;;  %v627_v32 = vsub.f32 0.0, %v499_v7 }
 0x107   : > { %v1567_v15 = vmul.f32 0.5, %v439_v8  ;;  %v361_v17 = vpop.f32.mrb[8].mxu0  ;;  %v409_v19 = vpop.f32.mrb[8].mxu1  ;;  %v1574_v27 = vmul.f32 0.5, %v455_v18  ;;  %v534_v36 = vmin.f32 %v500_v10, %v501_v11  ;;  %v558_v41 = vmin.f32 %v516_v14, %v517_v16 }
 0x108   : > { %v502_v20 = vmax.f32 %v1564_v12, 0.0  ;;  %v440_v21 = vsub.f32 1.0, %v361_v17  ;;  %v363_v23 = vpop.f32.mrb[9].mxu0  ;;  %v411_v24 = vpop.f32.mrb[9].mxu1  ;;  %v518_v34 = vmax.f32 %v1571_v22, 0.0  ;;  %v456_v58 = vsub.f32 1.0, %v409_v19 }
 0x109   : > { %v503_v25 = vmax.f32 %v1567_v15, 0.0  ;;  %v441_v26 = vsub.f32 1.0, %v363_v23  ;;  %v1933_v38 = vmax.f32 %v1574_v27, 0.0  ;;  %532 = vmin.xlane.f32.xlu0 %v531_v28  ;;  %535 = vmin.xlane.f32.xlu1 %v534_v36  ;;  %v457_v62 = vsub.f32 1.0, %v411_v24 }
 0x10a   : > { %v1580_v33 = vmul.f32 0.5, %v440_v21  ;;  %v1613_v9 = vmul.f32 0.5, %v456_v58  ;;  %v628_v43 = vsub.f32 0.0, %v500_v10  ;;  %v629_v46 = vsub.f32 0.0, %v501_v11 }
 0x10b   : > { %v1587_v37 = vmul.f32 0.5, %v441_v26  ;;  %v367_v39 = vpop.f32.mrb[10].mxu0  ;;  %v415_v42 = vpop.f32.mrb[10].mxu1  ;;  %v537_v52 = vmin.f32 %v502_v20, %v503_v25  ;;  %v561_v0 = vmin.f32 %v518_v34, %v1933_v38  ;;  %v1616_v23 = vmul.f32 0.5, %v457_v62 }
 0x10c   : > { %v1930_v47 = vmax.f32 %v1580_v33, 0.0  ;;  %v442_v48 = vsub.f32 1.0, %v367_v39  ;;  %v369_v51 = vpop.f32.mrb[11].mxu0  ;;  %v417_v53 = vpop.f32.mrb[11].mxu1  ;;  %v458_v18 = vsub.f32 1.0, %v415_v42  ;;  %v1939_v42 = vmax.f32 %v1613_v9, 0.0 }
 0x10d   : > { %v1929_v54 = vmax.f32 %v1587_v37, 0.0  ;;  %v443_v57 = vsub.f32 1.0, %v369_v51  ;;  %559 = vmin.xlane.f32.xlu0 %v558_v41  ;;  %538 = vmin.xlane.f32.xlu1 %v537_v52  ;;  %v459_v26 = vsub.f32 1.0, %v417_v53  ;;  %v1938_v53 = vmax.f32 %v1616_v23, 0.0 }
 0x10e   : > { %v1600_v60 = vmul.f32 0.5, %v442_v48  ;;  %v1620_v36 = vmul.f32 0.5, %v458_v18  ;;  %v644_v55 = vsub.f32 0.0, %v516_v14  ;;  %v645_v61 = vsub.f32 0.0, %v517_v16 }
 0x10f   : > { %v1606_v1 = vmul.f32 0.5, %v443_v57  ;;  %v373_v2 = vpop.f32.mrb[12].mxu0  ;;  %v540_v4 = vmin.f32 %v1930_v47, %v1929_v54  ;;  %v421_v5 = vpop.f32.mrb[12].mxu1  ;;  %v1624_v48 = vmul.f32 0.5, %v459_v26  ;;  %v646_v15 = vsub.f32 0.0, %v518_v34 }
 0x110   : > { %v1932_v8 = vmax.f32 %v1600_v60, 0.0  ;;  %v444_v13 = vsub.f32 1.0, %v373_v2  ;;  %v375_v17 = vpop.f32.mrb[13].mxu0  ;;  %v423_v19 = vpop.f32.mrb[13].mxu1 }
 0x111   : > { %v1931_v21 = vmax.f32 %v1606_v1, 0.0  ;;  %v445_v24 = vsub.f32 1.0, %v375_v17  ;;  %541 = vmin.xlane.f32.xlu0 %v540_v4  ;;  %562 = vmin.xlane.f32.xlu1 %v561_v0  ;;  %v1937_v17 = vmax.f32 %v1620_v36, 0.0  ;;  %v460_v0 = vsub.f32 1.0, %v421_v5 }
 0x112   : > { %v1618_v28 = vmul.f32 0.5, %v444_v13  ;;  %v564_v5 = vmin.f32 %v1939_v42, %v1938_v53 }
 0x113   : > { %v1622_v39 = vmul.f32 0.5, %v445_v24  ;;  %v379_v41 = vpop.f32.mrb[14].mxu0  ;;  %v427_v51 = vpop.f32.mrb[14].mxu1  ;;  %v543_v4 = vmin.f32 %v1932_v8, %v1931_v21  ;;  %v1934_v24 = vmax.f32 %v1624_v48, 0.0  ;;  %v1641_v47 = vmul.f32 0.5, %v460_v0 }
 0x114   : > { %v508_v52 = vmax.f32 %v1618_v28, 0.0  ;;  %v446_v57 = vsub.f32 1.0, %v379_v41  ;;  %v381_v58 = vpop.f32.mrb[15].mxu0  ;;  %v429_v62 = vpop.f32.mrb[15].mxu1  ;;  %v461_v41 = vsub.f32 1.0, %v423_v19  ;;  %v462_v21 = vsub.f32 1.0, %v427_v51 }
 0x115   : > { %v1942_v2 = vmax.f32 %v1622_v39, 0.0  ;;  %v447_v13 = vsub.f32 1.0, %v381_v58  ;;  %544 = vmin.xlane.f32.xlu1 %v543_v4  ;;  %v463_v38 = vsub.f32 1.0, %v429_v62  ;;  %v1941_v19 = vmax.f32 %v1641_v47, 0.0 }
 0x116   : > { %v1635_v18 = vmul.f32 0.5, %v446_v57  ;;  %v1648_v8 = vmul.f32 0.5, %v461_v41  ;;  %v567_v51 = vmin.f32 %v1937_v17, %v1934_v24 }
 0x117   : > { %v1638_v26 = vmul.f32 0.5, %v447_v13  ;;  %v546_v58 = vmin.f32 %v508_v52, %v1942_v2  ;;  %v1655_v13 = vmul.f32 0.5, %v462_v21  ;;  %v1662_v0 = vmul.f32 0.5, %v463_v38 }
 0x118   : > { %v1936_v54 = vmax.f32 %v1635_v18, 0.0  ;;  %v1940_v4 = vmax.f32 %v1648_v8, 0.0 }
 0x119   : > { %v1935_v57 = vmax.f32 %v1638_v26, 0.0  ;;  %547 = vmin.xlane.f32.xlu0 %v546_v58  ;;  %v526_v41 = vmax.f32 %v1655_v13, 0.0  ;;  %v1943_v58 = vmax.f32 %v1662_v0, 0.0 }
 0x11a   : > { %v570_v21 = vmin.f32 %v1941_v19, %v1940_v4 }
 0x11b   : > { %v549_v62 = vmin.f32 %v1936_v54, %v1935_v57  ;;  %v573_v38 = vmin.f32 %v526_v41, %v1943_v58 }
 0x11d   : > { %550 = vmin.xlane.f32.xlu1 %v549_v62  ;;  %565 = vmin.xlane.f32.xlu0 %v564_v5 }
 0x121   : > { %568 = vmin.xlane.f32.xlu1 %v567_v51  ;;  %571 = vmin.xlane.f32.xlu0 %v570_v21  ;;  %v624_v51 = vsub.f32 0.0, %v496_v35 }
 0x125   : > { %574 = vmin.xlane.f32.xlu1 %v573_v38 }
 0x18e   : > { %v530_v24 = vpop.xlane.xlu0 %529 }
 0x18f   : > { %v576_v57 = vadd.f32 1e-05, %v530_v24  ;;  %v625_v24 = vsub.f32 0.0, %v497_v40 }
 0x191   : > { %1157 = vrcp.f32 %v576_v57 }
 0x192   : > { %v557_v54 = vpop.xlane.xlu1 %556  ;;  %v554_v62 = vpop.xlane.xlu0 %553 }
 0x193   : > { %v585_v17 = vadd.f32 1e-05, %v557_v54  ;;  %v584_v53 = vadd.f32 1e-05, %v554_v62 }
 0x195   : > { %1159 = vrcp.f32 %v585_v17 }
 0x196   : > { %1161 = vrcp.f32 %v584_v53  ;;  %v533_v42 = vpop.xlane.xlu0 %532  ;;  %v536_v5 = vpop.xlane.xlu1 %535  ;;  %v640_v53 = vsub.f32 0.0, %v512_v44 }
 0x197   : > { %v577_v4 = vadd.f32 1e-05, %v533_v42  ;;  %v578_v19 = vadd.f32 1e-05, %v536_v5 }
 0x199   : > { %1163 = vrcp.f32 %v577_v4 }
 0x19a   : > { %1165 = vrcp.f32 %v578_v19  ;;  %v560_v58 = vpop.xlane.xlu0 %559  ;;  %v539_v21 = vpop.xlane.xlu1 %538  ;;  %v641_v19 = vsub.f32 0.0, %v513_v45 }
 0x19b   : > { %v1158_v2 = vpop.eup %1157  ;;  %v586_v54 = vadd.f32 1e-05, %v560_v58  ;;  %v579_v38 = vadd.f32 1e-05, %v539_v21 }
 0x19c   : > { %v608_v57 = vmul.f32 2.0, %v1158_v2 }
 0x19d   : > { %1167 = vrcp.f32 %v586_v54 }
 0x19e   : > { %v656_v42 = vmul.f32 %v624_v51, %v608_v57  ;;  %v657_v17 = vmul.f32 %v625_v24, %v608_v57  ;;  %1169 = vrcp.f32 %v579_v38  ;;  %v542_v35 = vpop.xlane.xlu0 %541  ;;  %v563_v62 = vpop.xlane.xlu1 %562 }
 0x19f   : > { %v1160_v4 = vpop.eup %1159  ;;  %v587_v5 = vadd.f32 1e-05, %v563_v62  ;;  %v580_v49 = vadd.f32 1e-05, %v542_v35 }
 0x1a0   : > { %v1162_v40 = vpop.eup %1161  ;;  %v688_v44 = vmul.f32 1.442695, %v656_v42  ;;  %v690_v2 = vmul.f32 1.442695, %v657_v17  ;;  %v617_v58 = vmul.f32 2.0, %v1160_v4  ;;  %v630_v42 = vsub.f32 0.0, %v502_v20 }
 0x1a1   : > { %v616_v45 = vmul.f32 2.0, %v1162_v40 }
 0x1a2   : > { %1171 = vpow2.f32 %v688_v44  ;;  %v674_v50 = vmul.f32 %v642_v30, %v617_v58  ;;  %v675_v6 = vmul.f32 %v643_v31, %v617_v58  ;;  %v545_v54 = vpop.xlane.xlu1 %544 }
 0x1a3   : > { %1173 = vpow2.f32 %v690_v2  ;;  %v672_v56 = vmul.f32 %v640_v53, %v616_v45  ;;  %v673_v51 = vmul.f32 %v641_v19, %v616_v45  ;;  %v1164_v24 = vpop.eup %1163  ;;  %v581_v53 = vadd.f32 1e-05, %v545_v54 }
 0x1a4   : > { %v724_v7 = vmul.f32 1.442695, %v674_v50  ;;  %v726_v57 = vmul.f32 1.442695, %v675_v6  ;;  %1175 = vrcp.f32 %v587_v5  ;;  %v1166_v21 = vpop.eup %1165  ;;  %v609_v38 = vmul.f32 2.0, %v1164_v24 }
 0x1a5   : > { %v720_v59 = vmul.f32 1.442695, %v672_v56  ;;  %v722_v10 = vmul.f32 1.442695, %v673_v51  ;;  %1177 = vrcp.f32 %v580_v49  ;;  %v610_v11 = vmul.f32 2.0, %v1166_v21 }
 0x1a6   : > { %1179 = vpow2.f32 %v724_v7  ;;  %v658_v63 = vmul.f32 %v626_v29, %v609_v38  ;;  %v659_v14 = vmul.f32 %v627_v32, %v609_v38  ;;  %v548_v17 = vpop.xlane.xlu0 %547  ;;  %v631_v19 = vsub.f32 0.0, %v503_v25 }
 0x1a7   : > { %1181 = vpow2.f32 %v726_v57  ;;  %v1168_v4 = vpop.eup %1167  ;;  %v660_v30 = vmul.f32 %v628_v43, %v610_v11  ;;  %v661_v35 = vmul.f32 %v629_v46, %v610_v11  ;;  %v1946_v5 = vmax.f32 %v1574_v27, 0.0 }
 0x1a8   : > { %1183 = vpow2.f32 %v720_v59  ;;  %v1170_v40 = vpop.eup %1169  ;;  %v692_v3 = vmul.f32 1.442695, %v658_v63  ;;  %v694_v16 = vmul.f32 1.442695, %v659_v14  ;;  %v618_v31 = vmul.f32 2.0, %v1168_v4 }
 0x1a9   : > { %1185 = vpow2.f32 %v722_v10  ;;  %v696_v44 = vmul.f32 1.442695, %v660_v30  ;;  %v698_v2 = vmul.f32 1.442695, %v661_v35  ;;  %v611_v12 = vmul.f32 2.0, %v1170_v40 }
 0x1aa   : > { %1187 = vrcp.f32 %v581_v53  ;;  %v676_v20 = vmul.f32 %v644_v55, %v618_v31  ;;  %v677_v29 = vmul.f32 %v645_v61, %v618_v31  ;;  %v551_v58 = vpop.xlane.xlu1 %550  ;;  %v647_v49 = vsub.f32 0.0, %v1946_v5  ;;  %v566_v6 = vpop.xlane.xlu0 %565 }
 0x1ab   : > { %1189 = vpow2.f32 %v692_v3  ;;  %v662_v25 = vmul.f32 %v630_v42, %v611_v12  ;;  %v663_v32 = vmul.f32 %v631_v19, %v611_v12  ;;  %v1947_v56 = vmax.f32 %v1580_v33, 0.0 }
 0x1ac   : > { %v1706_v62 = vpop.eup %1171  ;;  %1191 = vpow2.f32 %v694_v16  ;;  %v728_v43 = vmul.f32 1.442695, %v676_v20  ;;  %v730_v50 = vmul.f32 1.442695, %v677_v29  ;;  %v582_v7 = vadd.f32 1e-05, %v548_v17 }
 0x1ad   : > { %v1710_v45 = vpop.eup %1173  ;;  %1193 = vpow2.f32 %v696_v44  ;;  %v632_v51 = vsub.f32 0.0, %v1947_v56  ;;  %v700_v24 = vmul.f32 1.442695, %v662_v25  ;;  %v702_v22 = vmul.f32 1.442695, %v663_v32 }
 0x1ae   : > { %v1176_v46 = vpop.eup %1175  ;;  %1195 = vpow2.f32 %v698_v2  ;;  %v752_v57 = vadd.f32 %v1710_v45, %v1706_v62  ;;  %v1948_v54 = vmax.f32 %v1587_v37, 0.0  ;;  %v588_v10 = vadd.f32 1e-05, %v566_v6  ;;  %v569_v11 = vpop.xlane.xlu1 %568 }
 0x1af   : > { %v1178_v34 = vpop.eup %1177  ;;  %1197 = vpow2.f32 %v728_v43  ;;  %v619_v55 = vmul.f32 2.0, %v1176_v46  ;;  %v1949_v37 = vmax.f32 %v1600_v60, 0.0  ;;  %v572_v30 = vpop.xlane.xlu0 %571  ;;  %v1950_v44 = vmax.f32 %v1606_v1, 0.0 }
 0x1b0   : > { %v1718_v27 = vpop.eup %1179  ;;  %v633_v21 = vsub.f32 0.0, %v1948_v54  ;;  %1199 = vpow2.f32 %v730_v50  ;;  %v612_v59 = vmul.f32 2.0, %v1178_v34  ;;  %753 = vadd.xlane.f32.xlu0 %v752_v57  ;;  %v583_v60 = vadd.f32 1e-05, %v551_v58 }
 0x1b1   : > { %v1722_v33 = vpop.eup %1181  ;;  %1201 = vpow2.f32 %v700_v24  ;;  %v678_v38 = vmul.f32 %v646_v15, %v619_v55  ;;  %v679_v61 = vmul.f32 %v647_v49, %v619_v55  ;;  %v634_v17 = vsub.f32 0.0, %v1949_v37 }
 0x1b2   : > { %v1724_v53 = vpop.eup %1183  ;;  %1203 = vpow2.f32 %v702_v22  ;;  %v664_v42 = vmul.f32 %v632_v51, %v612_v59  ;;  %v665_v63 = vmul.f32 %v633_v21, %v612_v59  ;;  %v635_v2 = vsub.f32 0.0, %v1950_v44  ;;  %v575_v5 = vpop.xlane.xlu1 %574 }
 0x1b3   : > { %v1726_v14 = vpop.eup %1185  ;;  %v732_v4 = vmul.f32 1.442695, %v678_v38  ;;  %v734_v19 = vmul.f32 1.442695, %v679_v61  ;;  %1205 = vrcp.f32 %v582_v7  ;;  %v590_v29 = vadd.f32 1e-05, %v572_v30 }
 0x1b4   : > { %v1188_v35 = vpop.eup %1187  ;;  %v704_v40 = vmul.f32 1.442695, %v664_v42  ;;  %v706_v3 = vmul.f32 1.442695, %v665_v63  ;;  %1207 = vrcp.f32 %v588_v10  ;;  %v776_v16 = vadd.f32 %v1726_v14, %v1724_v53 }
 0x1b5   : > { %v1732_v31 = vpop.eup %1189  ;;  %1209 = vpow2.f32 %v732_v4  ;;  %v613_v12 = vmul.f32 2.0, %v1188_v35  ;;  %v589_v1 = vadd.f32 1e-05, %v569_v11  ;;  %v591_v51 = vadd.f32 1e-05, %v575_v5 }
 0x1b6   : > { %v1736_v20 = vpop.eup %1191  ;;  %1211 = vpow2.f32 %v734_v19  ;;  %777 = vadd.xlane.f32.xlu0 %v776_v16  ;;  %v779_v34 = vadd.f32 %v1722_v33, %v1718_v27  ;;  %v636_v54 = vsub.f32 0.0, %v508_v52  ;;  %v1951_v21 = vmax.f32 %v1622_v39, 0.0 }
 0x1b7   : > { %v1738_v15 = vpop.eup %1193  ;;  %1213 = vpow2.f32 %v704_v40  ;;  %v666_v25 = vmul.f32 %v634_v17, %v613_v12  ;;  %v667_v32 = vmul.f32 %v635_v2, %v613_v12  ;;  %v755_v49 = vadd.f32 %v1736_v20, %v1732_v31 }
 0x1b8   : > { %v1742_v43 = vpop.eup %1195  ;;  %1215 = vpow2.f32 %v706_v3  ;;  %v637_v59 = vsub.f32 0.0, %v1951_v21  ;;  %v1952_v61 = vmax.f32 %v1613_v9, 0.0  ;;  %v1953_v42 = vmax.f32 %v1616_v23, 0.0 }
 0x1b9   : > { %v1744_v50 = vpop.eup %1197  ;;  %v708_v58 = vmul.f32 1.442695, %v666_v25  ;;  %v710_v6 = vmul.f32 1.442695, %v667_v32  ;;  %1217 = vrcp.f32 %v583_v60  ;;  %v758_v46 = vadd.f32 %v1742_v43, %v1738_v15  ;;  %756 = vadd.xlane.f32.xlu1 %v755_v49 }
 0x1ba   : > { %v1748_v56 = vpop.eup %1199  ;;  %1219 = vrcp.f32 %v590_v29  ;;  %v648_v11 = vsub.f32 0.0, %v1952_v61  ;;  %v649_v63 = vsub.f32 0.0, %v1953_v42  ;;  %v1954_v9 = vmax.f32 %v1620_v36, 0.0 }
 0x1bb   : > { %v1750_v24 = vpop.eup %1201  ;;  %1221 = vpow2.f32 %v708_v58  ;;  %759 = vadd.xlane.f32.xlu0 %v758_v46  ;;  %v782_v22 = vadd.f32 %v1748_v56, %v1744_v50  ;;  %v1955_v25 = vmax.f32 %v1635_v18, 0.0  ;;  %v1956_v5 = vmax.f32 %v1638_v26, 0.0 }
 0x1bc   : > { %v1756_v55 = vpop.eup %1203  ;;  %1223 = vpow2.f32 %v710_v6  ;;  %v650_v23 = vsub.f32 0.0, %v1954_v9  ;;  %v1957_v58 = vmax.f32 %v1641_v47, 0.0  ;;  %v1958_v46 = vmax.f32 %v1648_v8, 0.0 }
 0x1bd   : > { %v1206_v7 = vpop.eup %1205  ;;  %1225 = vrcp.f32 %v589_v1  ;;  %780 = vadd.xlane.f32.xlu1 %v779_v34  ;;  %v761_v17 = vadd.f32 %v1756_v55, %v1750_v24  ;;  %v638_v32 = vsub.f32 0.0, %v1955_v25  ;;  %v639_v49 = vsub.f32 0.0, %v1956_v5 }
 0x1be   : > { %v1208_v57 = vpop.eup %1207  ;;  %v614_v10 = vmul.f32 2.0, %v1206_v7  ;;  %1227 = vrcp.f32 %v591_v51  ;;  %v652_v6 = vsub.f32 0.0, %v1957_v58  ;;  %v653_v51 = vsub.f32 0.0, %v1958_v46 }
 0x1bf   : > { %v1762_v38 = vpop.eup %1209  ;;  %v620_v37 = vmul.f32 2.0, %v1208_v57  ;;  %783 = vadd.xlane.f32.xlu0 %v782_v22  ;;  %v1959_v18 = vmax.f32 %v1624_v48, 0.0  ;;  %v1960_v48 = vmax.f32 %v1662_v0, 0.0 }
 0x1c0   : > { %v1770_v28 = vpop.eup %1211  ;;  %v668_v52 = vmul.f32 %v636_v54, %v614_v10  ;;  %v669_v39 = vmul.f32 %v637_v59, %v614_v10  ;;  %v654_v10 = vsub.f32 0.0, %v526_v41 }
 0x1c1   : > { %v1772_v4 = vpop.eup %1213  ;;  %v680_v19 = vmul.f32 %v648_v11, %v620_v37  ;;  %v681_v30 = vmul.f32 %v649_v63, %v620_v37  ;;  %762 = vadd.xlane.f32.xlu1 %v761_v17  ;;  %v785_v60 = vadd.f32 %v1770_v28, %v1762_v38  ;;  %v651_v26 = vsub.f32 0.0, %v1959_v18 }
 0x1c2   : > { %v1774_v35 = vpop.eup %1215  ;;  %v712_v40 = vmul.f32 1.442695, %v668_v52  ;;  %v714_v3 = vmul.f32 1.442695, %v669_v39  ;;  %v655_v63 = vsub.f32 0.0, %v1960_v48 }
 0x1c3   : > { %v1218_v16 = vpop.eup %1217  ;;  %v736_v44 = vmul.f32 1.442695, %v680_v19  ;;  %v738_v2 = vmul.f32 1.442695, %v681_v30  ;;  %v764_v12 = vadd.f32 %v1774_v35, %v1772_v4 }
 0x1c4   : > { %v1220_v29 = vpop.eup %1219  ;;  %1229 = vpow2.f32 %v712_v40  ;;  %v615_v36 = vmul.f32 2.0, %v1218_v16 }
 0x1c5   : > { %v1786_v1 = vpop.eup %1221  ;;  %1231 = vpow2.f32 %v714_v3  ;;  %v622_v22 = vmul.f32 2.0, %v1220_v29  ;;  %765 = vadd.xlane.f32.xlu0 %v764_v12  ;;  %786 = vadd.xlane.f32.xlu1 %v785_v60 }
 0x1c6   : > { %v1792_v34 = vpop.eup %1223  ;;  %1233 = vpow2.f32 %v736_v44  ;;  %v670_v7 = vmul.f32 %v638_v32, %v615_v36  ;;  %v671_v57 = vmul.f32 %v639_v49, %v615_v36 }
 0x1c7   : > { %v1226_v54 = vpop.eup %1225  ;;  %1235 = vpow2.f32 %v738_v2  ;;  %v684_v21 = vmul.f32 %v652_v6, %v622_v22  ;;  %v685_v47 = vmul.f32 %v653_v51, %v622_v22  ;;  %v767_v8 = vadd.f32 %v1792_v34, %v1786_v1 }
 0x1c8   : > { %v1228_v59 = vpop.eup %1227  ;;  %v716_v61 = vmul.f32 1.442695, %v670_v7  ;;  %v718_v11 = vmul.f32 1.442695, %v671_v57  ;;  %v621_v42 = vmul.f32 2.0, %v1226_v54 }
 0x1c9   : > { %v744_v37 = vmul.f32 1.442695, %v684_v21  ;;  %v746_v17 = vmul.f32 1.442695, %v685_v47  ;;  %v623_v52 = vmul.f32 2.0, %v1228_v59  ;;  %768 = vadd.xlane.f32.xlu1 %v767_v8 }
 0x1ca   : > { %1237 = vpow2.f32 %v716_v61  ;;  %v682_v39 = vmul.f32 %v650_v23, %v621_v42  ;;  %v683_v19 = vmul.f32 %v651_v26, %v621_v42 }
 0x1cb   : > { %1239 = vpow2.f32 %v718_v11  ;;  %v686_v30 = vmul.f32 %v654_v10, %v623_v52  ;;  %v687_v9 = vmul.f32 %v655_v63, %v623_v52 }
 0x1cc   : > { %1241 = vpow2.f32 %v744_v37  ;;  %v740_v40 = vmul.f32 1.442695, %v682_v39  ;;  %v742_v13 = vmul.f32 1.442695, %v683_v19 }
 0x1cd   : > { %1243 = vpow2.f32 %v746_v17  ;;  %v748_v41 = vmul.f32 1.442695, %v686_v30  ;;  %v750_v3 = vmul.f32 1.442695, %v687_v9 }
 0x1ce   : > { %v1802_v16 = vpop.eup %1229  ;;  %1245 = vpow2.f32 %v740_v40 }
 0x1cf   : > { %v1804_v0 = vpop.eup %1231  ;;  %1247 = vpow2.f32 %v742_v13 }
 0x1d0   : > { %v1806_v44 = vpop.eup %1233  ;;  %1249 = vpow2.f32 %v748_v41  ;;  %v770_v23 = vadd.f32 %v1804_v0, %v1802_v16 }
 0x1d1   : > { %v1810_v2 = vpop.eup %1235  ;;  %1251 = vpow2.f32 %v750_v3 }
 0x1d2   : > { %771 = vadd.xlane.f32.xlu0 %v770_v23  ;;  %v788_v12 = vadd.f32 %v1810_v2, %v1806_v44 }
 0x1d4   : > { %v1814_v60 = vpop.eup %1237 }
 0x1d5   : > { %v1816_v29 = vpop.eup %1239 }
 0x1d6   : > { %v1818_v25 = vpop.eup %1241  ;;  %789 = vadd.xlane.f32.xlu0 %v788_v12  ;;  %v773_v32 = vadd.f32 %v1816_v29, %v1814_v60 }
 0x1d7   : > { %v1822_v5 = vpop.eup %1243 }
 0x1d8   : > { %v1824_v49 = vpop.eup %1245  ;;  %774 = vadd.xlane.f32.xlu1 %v773_v32  ;;  %v794_v36 = vadd.f32 %v1822_v5, %v1818_v25 }
 0x1d9   : > { %v1828_v58 = vpop.eup %1247 }
 0x1da   : > { %v1830_v6 = vpop.eup %1249  ;;  %795 = vadd.xlane.f32.xlu0 %v794_v36  ;;  %v791_v46 = vadd.f32 %v1828_v58, %v1824_v49 }
 0x1db   : > { %v1834_v51 = vpop.eup %1251 }
 0x1dc   : > { %792 = vadd.xlane.f32.xlu1 %v791_v46  ;;  %v797_v22 = vadd.f32 %v1834_v51, %v1830_v6 }
 0x1e0   : > { %798 = vadd.xlane.f32.xlu1 %v797_v22 }
 0x23d   : > { %v754_v18 = vpop.xlane.xlu0 %753 }
 0x243   : > { %v778_v26 = vpop.xlane.xlu0 %777 }
 0x246   : > { %v757_v7 = vpop.xlane.xlu1 %756 }
 0x248   : > { %v760_v54 = vpop.xlane.xlu0 %759 }
 0x249   : > { %1253 = vrcp.f32 %v760_v54 }
 0x24a   : > { %v781_v57 = vpop.xlane.xlu1 %780  ;;  %1255 = vrcp.f32 %v754_v18 }
 0x24c   : > { %v784_v47 = vpop.xlane.xlu0 %783 }
 0x24e   : > { %v763_v21 = vpop.xlane.xlu1 %762 }
 0x252   : > { %v787_v8 = vpop.xlane.xlu1 %786  ;;  %v766_v59 = vpop.xlane.xlu0 %765 }
 0x253   : > { %1257 = vrcp.f32 %v766_v59  ;;  %v1254_v11 = vpop.eup %1253 }
 0x254   : > { %1259 = vrcp.f32 %v778_v26  ;;  %v1256_v42 = vpop.eup %1255  ;;  %v820_v37 = vmul.f32 %v1254_v11, %v1738_v15  ;;  %v821_v17 = vmul.f32 %v1254_v11, %v1742_v43 }
 0x255   : > { %1261 = vrcp.f32 %v763_v21  ;;  %v816_v19 = vmul.f32 %v1256_v42, %v1706_v62  ;;  %v817_v9 = vmul.f32 %v1256_v42, %v1710_v45 }
 0x256   : > { %v769_v10 = vpop.xlane.xlu1 %768  ;;  %1263 = vrcp.f32 %v757_v7 }
 0x257   : > { %1265 = vrcp.f32 %v769_v10  ;;  %v849_v23 = vmax.f32 %v816_v19, %v820_v37  ;;  %v870_v43 = vmax.f32 %v817_v9, %v821_v17 }
 0x25d   : > { %v1258_v63 = vpop.eup %1257 }
 0x25e   : > { %v1260_v39 = vpop.eup %1259  ;;  %v824_v40 = vmul.f32 %v1258_v63, %v1772_v4  ;;  %v825_v13 = vmul.f32 %v1258_v63, %v1774_v35 }
 0x25f   : > { %v772_v61 = vpop.xlane.xlu0 %771  ;;  %v1262_v30 = vpop.eup %1261  ;;  %v832_v22 = vmul.f32 %v1260_v39, %v1724_v53  ;;  %v833_v18 = vmul.f32 %v1260_v39, %v1726_v14 }
 0x260   : > { %1267 = vrcp.f32 %v772_v61  ;;  %v1264_v3 = vpop.eup %1263  ;;  %v822_v62 = vmul.f32 %v1262_v30, %v1750_v24  ;;  %v823_v36 = vmul.f32 %v1262_v30, %v1756_v55  ;;  %v851_v45 = vmax.f32 %v849_v23, %v824_v40 }
 0x261   : > { %1269 = vrcp.f32 %v784_v47  ;;  %v1266_v15 = vpop.eup %1265  ;;  %v872_v46 = vmax.f32 %v870_v43, %v825_v13  ;;  %v818_v26 = vmul.f32 %v1264_v3, %v1732_v31  ;;  %v819_v7 = vmul.f32 %v1264_v3, %v1736_v20 }
 0x262   : > { %1271 = vrcp.f32 %v781_v57  ;;  %v826_v55 = vmul.f32 %v1266_v15, %v1786_v1  ;;  %v827_v21 = vmul.f32 %v1266_v15, %v1792_v34 }
 0x263   : > { %v790_v48 = vpop.xlane.xlu0 %789 }
 0x265   : > { %v775_v52 = vpop.xlane.xlu1 %774 }
 0x266   : > { %1273 = vrcp.f32 %v775_v52 }
 0x267   : > { %1275 = vrcp.f32 %v790_v48  ;;  %v796_v41 = vpop.xlane.xlu0 %795 }
 0x268   : > { %1277 = vrcp.f32 %v787_v8  ;;  %v850_v8 = vmax.f32 %v818_v26, %v822_v62 }
 0x269   : > { %1279 = vrcp.f32 %v796_v41  ;;  %v793_v12 = vpop.xlane.xlu1 %792 }
 0x26a   : > { %v1268_v32 = vpop.eup %1267  ;;  %1281 = vrcp.f32 %v793_v12  ;;  %v852_v61 = vmax.f32 %v850_v8, %v826_v55 }
 0x26b   : > { %v828_v4 = vmul.f32 %v1268_v32, %v1802_v16  ;;  %v829_v35 = vmul.f32 %v1268_v32, %v1804_v0  ;;  %v1270_v57 = vpop.eup %1269  ;;  %v871_v0 = vmax.f32 %v819_v7, %v823_v36 }
 0x26c   : > { %v1272_v16 = vpop.eup %1271  ;;  %v836_v14 = vmul.f32 %v1270_v57, %v1744_v50  ;;  %v837_v31 = vmul.f32 %v1270_v57, %v1748_v56 }
 0x26d   : > { %v853_v54 = vmax.f32 %v851_v45, %v828_v4  ;;  %v874_v24 = vmax.f32 %v872_v46, %v829_v35  ;;  %v799_v47 = vpop.xlane.xlu1 %798  ;;  %v873_v11 = vmax.f32 %v871_v0, %v827_v21  ;;  %v834_v17 = vmul.f32 %v1272_v16, %v1718_v27 }
 0x26e   : > { %1283 = vrcp.f32 %v799_v47  ;;  %v835_v52 = vmul.f32 %v1272_v16, %v1722_v33  ;;  %v1383_v35 = vmov 1966171168  }
 0x26f   : > { %v855_v59 = vmax.f32 %v853_v54, %v832_v22  ;;  %v876_v53 = vmax.f32 %v874_v24, %v833_v18  ;;  %v895_v22 = vunpack.c.l.s4 %v1383_v35 }
 0x270   : > { %v1274_v10 = vpop.eup %1273 }
 0x271   : > { %v1276_v20 = vpop.eup %1275  ;;  %v830_v42 = vmul.f32 %v1274_v10, %v1814_v60  ;;  %v831_v1 = vmul.f32 %v1274_v10, %v1816_v29  ;;  %v857_v48 = vmax.f32 %v855_v59, %v836_v14  ;;  %v878_v63 = vmax.f32 %v876_v53, %v837_v31  ;;  %v848_v59 = vld [vmem:[#allocation2] sm:$0x3] }
 0x272   : > { %v1278_v34 = vpop.eup %1277  ;;  %v840_v56 = vmul.f32 %v1276_v20, %v1806_v44  ;;  %v841_v30 = vmul.f32 %v1276_v20, %v1810_v2  ;;  %v896_v57 = vunpack.c.0.s8 %v895_v22 }
 0x273   : > { %v1280_v37 = vpop.eup %1279  ;;  %v854_v39 = vmax.f32 %v852_v61, %v830_v42  ;;  %v875_v19 = vmax.f32 %v873_v11, %v831_v1  ;;  %v838_v9 = vmul.f32 %v1278_v34, %v1762_v38  ;;  %v839_v60 = vmul.f32 %v1278_v34, %v1770_v28 }
 0x274   : > { %v1282_v50 = vpop.eup %1281  ;;  %v859_v13 = vmax.f32 %v857_v48, %v840_v56  ;;  %v880_v41 = vmax.f32 %v878_v63, %v841_v30  ;;  %v844_v3 = vmul.f32 %v1280_v37, %v1818_v25  ;;  %v845_v27 = vmul.f32 %v1280_v37, %v1822_v5 }
 0x275   : > { %v856_v29 = vmax.f32 %v854_v39, %v834_v17  ;;  %v877_v40 = vmax.f32 %v875_v19, %v835_v52  ;;  %v842_v23 = vmul.f32 %v1282_v50, %v1824_v49  ;;  %v843_v44 = vmul.f32 %v1282_v50, %v1828_v58 }
 0x276   : > { %v861_v32 = vmax.f32 %v859_v13, %v844_v3  ;;  %v882_v62 = vmax.f32 %v880_v41, %v845_v27  ;;  %v897_v49 = vlaneseq }
 0x277   : > { %v858_v33 = vmax.f32 %v856_v29, %v838_v9  ;;  %v879_v15 = vmax.f32 %v877_v40, %v839_v60 }
 0x278   : > { %v1284_v43 = vpop.eup %1283  ;;  %v898_v54 = vshrl.u32 %v897_v49, 7  ;;  %vm912_vm3 = vcmp.lt.s32.totalorder %v897_v49, 256 }
 0x279   : > { %v860_v2 = vmax.f32 %v858_v33, %v842_v23  ;;  %v881_v12 = vmax.f32 %v879_v15, %v843_v44  ;;  %v846_v38 = vmul.f32 %v1284_v43, %v1830_v6  ;;  %v847_v28 = vmul.f32 %v1284_v43, %v1834_v51 }
 0x27a   : > { %v899_v21 = vsub.s32 %v896_v57, %v898_v54  ;;  %v923_v31 = vsub.s32 (!%p1073_p1), 0, %v898_v54  ;;  %v927_v20 = vsub.s32 (!%p1073_p1), 1, %v898_v54 }
 0x27b   : > { %v862_v36 = vmax.f32 %v860_v2, %v846_v38  ;;  %v883_v45 = vmax.f32 %v881_v12, %v847_v28 }
 0x27d   : > { %v863_v25 = vmax.f32 %v861_v32, %v862_v36  ;;  %v884_v46 = vmax.f32 %v882_v62, %v883_v45 }
 0x27f   : > { %v864_v5 = vrot.slane %v863_v25, 4  ;;  %v885_v4 = vrot.slane %v884_v46, 4 }
 0x281   : > { %v865_v18 = vmax.f32 %v863_v25, %v864_v5  ;;  %v886_v58 = vmax.f32 %v884_v46, %v885_v4 }
 0x283   : > { %v866_v26 = vrot.slane %v865_v18, 2  ;;  %v887_v7 = vrot.slane %v886_v58, 2 }
 0x285   : > { %v867_v6 = vmax.f32 %v865_v18, %v866_v26  ;;  %v888_v24 = vmax.f32 %v886_v58, %v887_v7 }
 0x287   : > { %v868_v51 = vrot.slane %v867_v6, 1  ;;  %v889_v55 = vrot.slane %v888_v24, 1 }
 0x289   : > { %v869_v47 = vmax.f32 %v867_v6, %v868_v51  ;;  %v890_v16 = vmax.f32 %v888_v24, %v889_v55 }
 0x28b   : > { %v893_v8 = vcombine.low %v869_v47, %v890_v16 }
 0x28d   : > { %v900_v0 = vrot.slane %v893_v8, %v899_v21  ;;  %918 = sbr.rel (%p1073_p1) target bundleno = 880 (0x370), region = 36 }
 0x28f   : > { %v907_v53 = vrot.slane %v900_v0, %v899_v21 }
 0x291   : > { %v909_v10 = vmax.f32 %v848_v59, %v907_v53 }
 0x293   : > { %914 = vst.msk [vmem:[#allocation2] sm:$0x3] %vm912_vm3, %v909_v10 }
 0x29a   : > { %v919_v14 = vld [vmem:[#allocation2] sm:$0x3] }
 0x29b   : > { %v924_v61 = vrot.slane %v919_v14, %v923_v31  ;;  %v928_v11 = vrot.slane %v919_v14, %v927_v20 }
 0x29d   : > { %v932_v42 = vsel %vm931_vm4, %v924_v61, 0.0  ;;  %v933_v1 = vsel %vm931_vm4, %v928_v11, 0.0 }
 0x29e   : > { %v934_v34 = vadd.f32 %v933_v1, %v932_v42 }
 0x2a0   : > { %935 = vadd.xlane.f32.xlu0 %v934_v34 }
 0x32d   : > { %v936_v48 = vpop.xlane.xlu0 %935 }
 0x32e   : > { %v937_v63 = vrot.slane %v936_v48, 4 }
 0x330   : > { %v938_v37 = vadd.f32 %v937_v63, %v936_v48 }
 0x332   : > { %v939_v17 = vrot.slane %v938_v37, 2 }
 0x334   : > { %v940_v52 = vadd.f32 %v939_v17, %v938_v37 }
 0x336   : > { %v941_v39 = vrot.slane %v940_v52, 1 }
 0x338   : > { %v942_v19 = vadd.f32 %v941_v39, %v940_v52 }
 0x33a   : > { %1080 = vpush %v942_v19 }
 0x36b   : > { %s1081_s12 = spop %1080 }
 0x36c   : > { %s944_s24 = smul.f32 0.00390625, %s1081_s12 }
 0x36e   : > { %v945_v50 = vstv %s944_s24 }
 0x36f   : > { %946 = vst [vmem:[%s1483_s23] sm:$0x1] %v945_v50 }
 0x370 PF: > { %s1074_s27 = sshll.u32 %s1367_s13, 4  ;;  %s960_s3 = sshll.u32 %s1483_s23, 4  ;;  %s961_s3 = int_to_ptr.vmem [resolvable:$true] %s960_s3 }
 0x371   : > { %s1876_s30 = scalar_lea.hbm %s1928_s2, %s1074_s27  ;;  %s948_s4 = scalar_lea.sflag [#allocation4], %s172_s26 }
 0x372   : > { %s1285_s5 = scalar_lea.vmem %s961_s3, 16  ;;  %s1384_s6 = smov [#allocation3]  }
 0x373   : > { %p1286_p2 = scmp.ne.s32.totalorder %s961_s3, %s1285_s5  ;;  %s1289_s7 = sshll.u32 %s1384_s6, 4  ;;  %s1290_s7 = int_to_ptr.vmem [resolvable:$false] %s1289_s7 }
 0x374   : > { %s1291_s8 = scalar_lea.vmem %s1290_s7, 32  ;;  %p1292_p6 = scmp.lt.s32.totalorder %s961_s3, %s1290_s7 }
 0x375   : > { %p1287_p4 = pnand %p1286_p2, %p1449_p3  ;;  %p1293_p7 = scmp.lt.s32.totalorder %s1291_s8, %s1285_s5 }
 0x377   : > { %p1288_p5 = pneg %p1287_p4  ;;  %p1294_p8 = por %p1293_p7, %p1292_p6 }
 0x379   : > { %p1295_p10 = pnand %p1294_p8, %p1288_p5 }
 0x37b   : > { %1298 = shalt.err (!%p1295_p10)
}
 0x37c   : > { %s1299_s13 = scalar_lea.hbm %s1876_s30, 16  ;;  %s1303_s18 = scalar_lea.hbm %s1928_s2, 32 }
 0x37d   : > { %p1300_p11 = scmp.ne.s32.totalorder %s1876_s30, %s1299_s13  ;;  %p1304_p0 = scmp.lt.u32.totalorder %s1876_s30, %s1928_s2 }
 0x37e   : > { %p1305_p1 = scmp.lt.u32.totalorder %s1303_s18, %s1299_s13  ;;  %p1307_p4 = scmp.lt.u32.totalorder %s1299_s13, %s1876_s30 }
 0x37f   : > { %p1301_p12 = pnand %p1300_p11, %p1449_p3 }
 0x380   : > { %p1306_p2 = por %p1305_p1, %p1304_p0 }
 0x381   : > { %p1302_p13 = pneg %p1301_p12 }
 0x382   : > { %p1308_p5 = por %p1307_p4, %p1306_p2 }
 0x384   : > { %p1309_p6 = pnand %p1308_p5, %p1302_p13 }
 0x386   : > { %1312 = shalt.err (!%p1309_p6)
}
 0x387   : > { %1082 = dma.vmem_to_hbm [thread:$0]  (%p1449_p3), %s961_s3, 16, %s1876_s30, %s948_s4  }
 0x388 PF: > { %p1088_p7 = scmp.ge.s32.totalorder %s1379_s16, 2  ;;  %s972_s24 = sand.u32 1, %s1351_s9  }
 0x389   : > { %s973_s27 = scalar_lea.sflag [#allocation4], %s972_s24 }
 0x38a   : > { %p1085_p8 = pnand %p1088_p7, %p1459_p9 }
 0x38c   : > { %1346 = dma.done.wait (!%p1085_p8), %s973_s27, 16  }
 0x38d   : > { %1348 = vsyncadd (!%p1085_p8), %s973_s27, 4294967280  ;;  %s15_s16 = sadd.s32 1, %s1379_s16   ;;  %s1961_s9 = smov %s1355_s10 }
 0x38e   : > { %p12_p10 = scmp.ge.s32.totalorder %s15_s16, 6   ;;  %s1962_s10 = smov %s1359_s11 }
 0x38f   : > { %s1963_s11 = smov %s1467_s25  ;;  %s1964_s12 = smov %s1371_s14 }
 0x390   : > { %s1965_s13 = smov %s1375_s15  ;;  %s1966_s14 = smov %s1969_s19 }
 0x391   : > { %s1967_s15 = smov %s1973_s20  ;;  %14 = sbr.rel (!%p12_p10) target bundleno = 5 (0x5), region = 74 }
 0x398   :  { %977 = vsyncpa [#allocation4], 1 }
 0x399   :  { %979 = vsyncpa [#allocation4 + $0x1], 1 }

</bundles_post_ra>
